<compile_context>
chip_gen: v6e
topology: v6e:2x2x1
jax: 0.10.0
libtpu: 0.0.40
codegen_flags: <defaults>
</compile_context>

<pallas_src>
import math

import jax
import jax.numpy as jnp
import numpy as np
from jax import lax
from jax.experimental import pallas as pl
from jax.experimental.pallas import tpu as pltpu


def _round_up(v: int, m: int) -> int:
    return ((v + m - 1) // m) * m


# ----------------------------------------------------------------------------
# Mask construction (parameter setup glue — mirrors MaskLinear.__init__)
# ----------------------------------------------------------------------------
def build_sparse_mask(in_features: int, out_features: int,
                      window_size: int = 6, stripes: int = 3, step: int = 1):
    pseudo = (min(in_features, out_features), max(in_features, out_features))
    tmp = np.zeros(pseudo, dtype=np.float32)
    stride = int(math.sqrt(pseudo[0]))
    d = math.ceil(pseudo[1] / pseudo[0])
    for k in range(stripes):
        patch_start = stride * k
        for i in range(0, pseudo[0], window_size):
            tmp[patch_start + i:patch_start + i + window_size,
                i * d:i * d + step * d * window_size] = 1
    for k in range(stripes):
        patch_start = stride * k
        for i in range(0, pseudo[0], window_size):
            tmp[i:i + window_size,
                (i + patch_start) * d:(patch_start + i) * d + step * d * window_size] = 1
    if in_features <= out_features:
        sparse_mask = tmp.T  # (out_features, in_features)
    else:
        sparse_mask = tmp    # already (out_features, in_features)
    return jnp.asarray(sparse_mask, dtype=jnp.float32)


def init_weight(key, in_features: int, out_features: int, sparse_mask):
    # kaiming_uniform_(a=sqrt(5)) -> U(-1/sqrt(fan_in), 1/sqrt(fan_in))
    bound = 1.0 / math.sqrt(in_features)
    w = jax.random.uniform(key, (out_features, in_features),
                           minval=-bound, maxval=bound, dtype=jnp.float32)
    # Scale uses the ORIGINAL float sparse_mask semantics (sum of the mask).
    scale = jnp.sqrt(jnp.sum(sparse_mask) / (in_features * out_features))
    return w / scale


# ----------------------------------------------------------------------------
# Pallas kernel: in-kernel weight masking + tiled MXU matmul with K reduction
# ----------------------------------------------------------------------------
def masklinear_kernel(x_ref, w_ref, m_ref, o_ref, acc_ref):
    # Zero the accumulator at the start of each K sweep.
    @pl.when(pl.program_id(2) == 0)
    def _():
        acc_ref[...] = jnp.zeros_like(acc_ref)

    w = w_ref[...]                                   # (tn, tk) f32
    w_masked = jnp.where(m_ref[...] != 0, w, jnp.zeros_like(w))

    # acc(tm, tn) += x(tm, tk) . w_masked(tn, tk) contracted on K — the
    # transpose is folded into dot_general, no XLU relayout of the tile.
    acc_ref[...] += lax.dot_general(
        x_ref[...], w_masked,
        dimension_numbers=(((1,), (1,)), ((), ())),
        preferred_element_type=jnp.float32)

    # Write back once per output tile, after the last K step.
    @pl.when(pl.program_id(2) == pl.num_programs(2) - 1)
    def _():
        o_ref[...] = acc_ref[...].astype(o_ref.dtype)


def mask_linear(x, weight, sparse_mask, sparse_mask_topk,
                *, tm_max: int = 256, tn_max: int = 256, tk_max: int = 512):
    """x: (..., in_features) -> (..., out_features)."""
    out_features, in_features = weight.shape
    lead = x.shape[:-1]
    x2d = x.reshape((-1, in_features))
    M, K, N = x2d.shape[0], in_features, out_features

    # Combined {0,1} mask as a single int8 operand:
    #   mask = sparse_mask_topk.bool() | sparse_mask.bool()
    mask_i8 = jnp.logical_or(sparse_mask_topk != 0,
                             sparse_mask != 0).astype(jnp.int8)

    # Tile sizes: lane-dense (128-multiple) N/K tiles, sublane-aligned M tile.
    tm = min(tm_max, _round_up(M, 8))
    tn = min(tn_max, _round_up(N, 128))
    tk = min(tk_max, _round_up(K, 128))

    Mp, Np, Kp = _round_up(M, tm), _round_up(N, tn), _round_up(K, tk)

    # Zero padding keeps the K-accumulation exact; extra M rows / N cols are
    # sliced away after the call.
    xp = jnp.pad(x2d, ((0, Mp - M), (0, Kp - K)))
    wp = jnp.pad(weight, ((0, Np - N), (0, Kp - K)))
    mp = jnp.pad(mask_i8, ((0, Np - N), (0, Kp - K)))

    grid = (Mp // tm, Np // tn, Kp // tk)

    cost = pl.CostEstimate(
        flops=2 * Mp * Np * Kp,
        transcendentals=0,
        bytes_accessed=(xp.size * 4 + wp.size * 4 + mp.size * 1 + Mp * Np * 4),
    )

    out = pl.pallas_call(
        masklinear_kernel,
        out_shape=jax.ShapeDtypeStruct((Mp, Np), x.dtype),
        grid_spec=pltpu.PrefetchScalarGridSpec(
            num_scalar_prefetch=0,
            grid=grid,
            in_specs=[
                pl.BlockSpec((tm, tk), lambda i, j, k: (i, k)),   # x tile
                pl.BlockSpec((tn, tk), lambda i, j, k: (j, k)),   # weight tile
                pl.BlockSpec((tn, tk), lambda i, j, k: (j, k)),   # int8 mask tile
            ],
            out_specs=pl.BlockSpec((tm, tn), lambda i, j, k: (i, j)),
            scratch_shapes=[pltpu.VMEM((tm, tn), jnp.float32)],
        ),
        compiler_params=pltpu.CompilerParams(
            dimension_semantics=("parallel", "parallel", "arbitrary")),
        cost_estimate=cost,
    )(xp, wp, mp)

    return out[:M, :N].reshape(lead + (out_features,))


# ----------------------------------------------------------------------------
if __name__ == "__main__":
    in_features = 32
    out_features = 64
    batch, seq = 2, 8

    key = jax.random.PRNGKey(0)
    k_w, k_x, k_topk = jax.random.split(key, 3)

    sparse_mask = build_sparse_mask(in_features, out_features,
                                    window_size=6, stripes=3, step=1)
    # Non-trivial top-k mask so the OR path is actually exercised.
    sparse_mask_topk = (jax.random.uniform(
        k_topk, (out_features, in_features)) > 0.9).astype(jnp.float32)
    weight = init_weight(k_w, in_features, out_features, sparse_mask)

    x = jax.random.normal(k_x, (batch, seq, in_features), dtype=jnp.float32)

    y = mask_linear(x, weight, sparse_mask, sparse_mask_topk)
    y = jax.block_until_ready(y)

    # Pure-JAX reference check
    mask = jnp.logical_or(sparse_mask_topk != 0,
                          sparse_mask != 0).astype(jnp.float32)
    y_ref = x @ (mask * weight).T
    assert y.shape == (batch, seq, out_features)
    assert jnp.allclose(y, y_ref, atol=1e-5, rtol=1e-5)

    print("KERNEL_OK")
</pallas_src>

<mosaic_0001>
module attributes {stable_mosaic.version = 11 : i64} {
  func.func @masklinear_kernel(%arg0: i32, %arg1: i32, %arg2: i32, %arg3: memref<16x128xf32, #tpu.memory_space<vmem>>, %arg4: memref<128x128xf32, #tpu.memory_space<vmem>>, %arg5: memref<128x128xi8, #tpu.memory_space<vmem>>, %arg6: memref<16x128xf32, #tpu.memory_space<vmem>>, %arg7: memref<16x128xf32, #tpu.memory_space<vmem>>) attributes {dimension_semantics = [#tpu.dimension_semantics<parallel>, #tpu.dimension_semantics<parallel>, #tpu.dimension_semantics<arbitrary>], iteration_bounds = array<i64: 1, 1, 1>, scalar_prefetch = 0 : i64, scratch_operands = 1 : i64, tpu.core_type = #tpu.core_type<tc>, window_params = [{transform_indices = @transform_0, window_bounds = array<i64: 16, 128>}, {transform_indices = @transform_1, window_bounds = array<i64: 128, 128>}, {transform_indices = @transform_2, window_bounds = array<i64: 128, 128>}, {transform_indices = @transform_3, window_bounds = array<i64: 16, 128>}]} {
    %c0_i32 = arith.constant 0 : i32
    %0 = arith.cmpi eq, %arg2, %c0_i32 : i32
    %1 = arith.extui %0 : i1 to i32
    %c0_i32_0 = arith.constant 0 : i32
    %2 = arith.cmpi ne, %1, %c0_i32_0 : i32
    scf.if %2 {
      %cst_13 = arith.constant 0.000000e+00 : f32
      %17 = vector.broadcast %cst_13 : f32 to vector<16x128xf32>
      %c0_14 = arith.constant 0 : index
      %c0_15 = arith.constant 0 : index
      %18 = vector.load %arg7[%c0_14, %c0_15] : memref<16x128xf32, #tpu.memory_space<vmem>>, vector<16x128xf32>
      tpu.vector_store %arg7[%c0_14, %c0_15], %17 {strides = array<i32>} : memref<16x128xf32, #tpu.memory_space<vmem>>, vector<16x128xf32>,
    } else {
    }
    %c0 = arith.constant 0 : index
    %c0_1 = arith.constant 0 : index
    %3 = vector.load %arg4[%c0, %c0_1] : memref<128x128xf32, #tpu.memory_space<vmem>>, vector<128x128xf32>
    %c0_2 = arith.constant 0 : index
    %c0_3 = arith.constant 0 : index
    %4 = vector.load %arg5[%c0_2, %c0_3] : memref<128x128xi8, #tpu.memory_space<vmem>>, vector<128x128xi8>
    %c0_i8 = arith.constant 0 : i8
    %5 = vector.broadcast %c0_i8 : i8 to vector<128x128xi8>
    %6 = arith.cmpi ne, %4, %5 : vector<128x128xi8>
    %cst = arith.constant 0.000000e+00 : f32
    %7 = vector.broadcast %cst : f32 to vector<128x128xf32>
    %8 = arith.select %6, %3, %7 : vector<128x128xi1>, vector<128x128xf32>
    %c0_4 = arith.constant 0 : index
    %c0_5 = arith.constant 0 : index
    %9 = vector.load %arg7[%c0_4, %c0_5] : memref<16x128xf32, #tpu.memory_space<vmem>>, vector<16x128xf32>
    %c0_6 = arith.constant 0 : index
    %c0_7 = arith.constant 0 : index
    %10 = vector.load %arg3[%c0_6, %c0_7] : memref<16x128xf32, #tpu.memory_space<vmem>>, vector<16x128xf32>
    %cst_8 = arith.constant dense<0.000000e+00> : vector<16x128xf32>
    %11 = tpu.matmul %10, %8, %cst_8 {dimension_numbers = #tpu.dot_dimension_numbers<[1], [1], [0], [0], [0, 0, 1, 0], [], []>} : vector<16x128xf32>, vector<128x128xf32>, vector<16x128xf32> -> vector<16x128xf32>
    %12 = arith.addf %9, %11 : vector<16x128xf32>
    %c0_9 = arith.constant 0 : index
    %c0_10 = arith.constant 0 : index
    %13 = vector.load %arg7[%c0_9, %c0_10] : memref<16x128xf32, #tpu.memory_space<vmem>>, vector<16x128xf32>
    tpu.vector_store %arg7[%c0_9, %c0_10], %12 {strides = array<i32>} : memref<16x128xf32, #tpu.memory_space<vmem>>, vector<16x128xf32>,
    %c0_i32_11 = arith.constant 0 : i32
    %14 = arith.cmpi eq, %arg2, %c0_i32_11 : i32
    %15 = arith.extui %14 : i1 to i32
    %c0_i32_12 = arith.constant 0 : i32
    %16 = arith.cmpi ne, %15, %c0_i32_12 : i32
    scf.if %16 {
      %c0_13 = arith.constant 0 : index
      %c0_14 = arith.constant 0 : index
      %17 = vector.load %arg7[%c0_13, %c0_14] : memref<16x128xf32, #tpu.memory_space<vmem>>, vector<16x128xf32>
      %c0_15 = arith.constant 0 : index
      %c0_16 = arith.constant 0 : index
      %18 = vector.load %arg6[%c0_15, %c0_16] : memref<16x128xf32, #tpu.memory_space<vmem>>, vector<16x128xf32>
      tpu.vector_store %arg6[%c0_15, %c0_16], %17 {strides = array<i32>} : memref<16x128xf32, #tpu.memory_space<vmem>>, vector<16x128xf32>,
    } else {
    }
    return
  }
  func.func @transform_0(%arg0: i32, %arg1: i32, %arg2: i32) -> (i32, i32) {
    %c0_i32 = arith.constant 0 : i32
    return %arg0, %arg2 : i32, i32
  }
  func.func @transform_1(%arg0: i32, %arg1: i32, %arg2: i32) -> (i32, i32) {
    %c0_i32 = arith.constant 0 : i32
    return %arg1, %arg2 : i32, i32
  }
  func.func @transform_2(%arg0: i32, %arg1: i32, %arg2: i32) -> (i32, i32) {
    %c0_i32 = arith.constant 0 : i32
    return %arg1, %arg2 : i32, i32
  }
  func.func @transform_3(%arg0: i32, %arg1: i32, %arg2: i32) -> (i32, i32) {
    %c0_i32 = arith.constant 0 : i32
    return %arg0, %arg1 : i32, i32
  }
}

</mosaic_0001>

<bundles_post_ra>
// kernel: tpu_custom_call.1
= control target key start
LH: loop header
LB: loop body
LE: loop exit
PB: predicated region body
PF: predicated region fallthrough
CT: control target
= control target key end

     0   :  { %8 = vsyncpa [#allocation4], 0  ;;  %s569_s0 = inlined_call_operand.hbm [shape: f32[16,128], index: 0, kind: input, shape index: {}]   ;;  %s570_s1 = inlined_call_operand.hbm [shape: f32[128,128], index: 1, kind: input, shape index: {}]   ;;  %s571_s2 = inlined_call_operand.hbm [shape: s8[128,128], index: 2, kind: input, shape index: {}]   ;;  %s572_s3 = inlined_call_operand.hbm [shape: f32[16,128], index: 3, kind: output, shape index: {}]  }
   0x1   :  { %9 = vsyncpa [#allocation7], 0 }
   0x2   :  { %10 = vsyncpa [#allocation5], 0  ;;  %s490_s12 = smov [#allocation6]   ;;  %s491_s14 = smov [#allocation3]  }
   0x3   :  { %s28_s13 = sshll.u32 %s490_s12, 4  ;;  %s16_s15 = sshll.u32 %s491_s14, 4  ;;  %s29_s13 = int_to_ptr.vmem [resolvable:$true] %s28_s13  ;;  %s17_s15 = int_to_ptr.vmem [resolvable:$true] %s16_s15 }
   0x4   :  { %s412_s16 = scalar_lea.vmem %s29_s13, 2048  ;;  %p417_p1 = scmp.lt.s32.totalorder %s29_s13, %s29_s13 }
   0x5   :  { %p413_p0 = scmp.ne.s32.totalorder %s29_s13, %s412_s16  ;;  %p418_p2 = scmp.lt.s32.totalorder %s412_s16, %s412_s16 }
   0x7   :  { %p419_p3 = por %p418_p2, %p417_p1 }
   0x9   :  { %p420_p4 = pnand %p419_p3, %p413_p0 }
   0xb   :  { %423 = shalt.err (!%p420_p4)
}
   0xc   :  { %s492_s17 = smov 128   ;;  %s493_s18 = smov 8  }
   0xd   :  { %34 = dma.hbm_to_vmem [thread:$0]  %s570_s1, 2048, %s29_s13, [#allocation7], %s492_s17, %s492_s17, %s493_s18  }
   0xe   :  { %s432_s21 = scalar_lea.vmem %s17_s15, 256  ;;  %p437_p6 = scmp.lt.s32.totalorder %s17_s15, %s17_s15 }
   0xf   :  { %p433_p5 = scmp.ne.s32.totalorder %s17_s15, %s432_s21  ;;  %p438_p7 = scmp.lt.s32.totalorder %s432_s21, %s432_s21 }
  0x11   :  { %p439_p8 = por %p438_p7, %p437_p6 }
  0x13   :  { %p440_p9 = pnand %p439_p8, %p433_p5 }
  0x15   :  { %443 = shalt.err (!%p440_p9)
}
  0x16   :  { %22 = dma.hbm_to_vmem [thread:$0]  %s569_s0, 256, %s17_s15, [#allocation4], %s492_s17, %s492_s17, %s493_s18  }
  0x17   :  { %s494_s24 = smov [#allocation8]  }
  0x18   :  { %s40_s25 = sshll.u32 %s494_s24, 4  ;;  %s41_s25 = int_to_ptr.vmem [resolvable:$true] %s40_s25 }
  0x19   :  { %s452_s26 = scalar_lea.vmem %s41_s25, 512  ;;  %p457_p11 = scmp.lt.s32.totalorder %s41_s25, %s41_s25 }
  0x1a   :  { %p453_p10 = scmp.ne.s32.totalorder %s41_s25, %s452_s26  ;;  %p458_p12 = scmp.lt.s32.totalorder %s452_s26, %s452_s26 }
  0x1c   :  { %p459_p13 = por %p458_p12, %p457_p11 }
  0x1e   :  { %p460_p0 = pnand %p459_p13, %p453_p10 }
  0x20   :  { %463 = shalt.err (!%p460_p0)
}
  0x21   :  { %46 = dma.hbm_to_vmem [thread:$0]  %s571_s2, 512, %s41_s25, [#allocation7], %s492_s17, %s492_s17, %s493_s18  }
  0x22   :  { %484 = dma.done.wait [#allocation4], 256  }
  0x23   :  { %485 = vsyncadd [#allocation4], 4294967040 }
  0x24   :  { %486 = dma.done.wait [#allocation7], 2560  }
  0x25   :  { %487 = vsyncadd [#allocation7], 4294964736  ;;  %v83_v0 = vld [vmem:[#allocation8 + $0x18] sm:$0xff]  ;;  %v495_v1 = vmov 0   ;;  %v82_v3 = vld [vmem:[#allocation8 + $0x10] sm:$0xff]  ;;  %s496_s0 = smov [#allocation9]  }
  0x26   :  { %vm87_vm0 = vnez %v83_v0  ;;  %vm86_vm1 = vnez %v82_v3  ;;  %v222_v17 = vld [vmem:[#allocation3] sm:$0xff]  ;;  %v81_v20 = vld [vmem:[#allocation8 + $0x8] sm:$0xff]  ;;  %v79_v25 = vld [vmem:[#allocation6 + $0x78] sm:$0xff]  ;;  %s315_s2 = sshll.u32 %s496_s0, 4  ;;  %s316_s2 = int_to_ptr.vmem [resolvable:$true] %s315_s2 }
  0x27   :  { %v91_v2 = vsel %vm87_vm0, 16843009, %v495_v1  ;;  %v90_v12 = vsel %vm86_vm1, 16843009, %v495_v1  ;;  %394 = vmatprep.mubr.f32.mxu0 %v222_v17  ;;  %v78_v31 = vld [vmem:[#allocation6 + $0x70] sm:$0xff]  ;;  %vm85_vm8 = vnez %v81_v20  ;;  %v77_v39 = vld [vmem:[#allocation6 + $0x68] sm:$0xff]  ;;  %p469_p2 = scmp.lt.s32.totalorder %s316_s2, %s316_s2 }
  0x28   :  { %v107_v4 = vunpack.c.3.s8 %v91_v2  ;;  %v106_v5 = vunpack.c.2.s8 %v91_v2  ;;  %v105_v6 = vunpack.c.1.s8 %v91_v2  ;;  %v104_v7 = vunpack.c.0.s8 %v91_v2  ;;  %v76_v45 = vld [vmem:[#allocation6 + $0x60] sm:$0xff]  ;;  %v75_v51 = vld [vmem:[#allocation6 + $0x58] sm:$0xff]  ;;  %v74_v58 = vld [vmem:[#allocation6 + $0x50] sm:$0xff]  ;;  %s464_s28 = scalar_lea.vmem %s316_s2, 256 }
  0x29   :  { %v103_v18 = vunpack.c.3.s8 %v90_v12  ;;  %v102_v19 = vunpack.c.2.s8 %v90_v12  ;;  %v101_v28 = vunpack.c.1.s8 %v90_v12  ;;  %v100_v37 = vunpack.c.0.s8 %v90_v12  ;;  %v80_v54 = vld [vmem:[#allocation8] sm:$0xff]  ;;  %v73_v2 = vld [vmem:[#allocation6 + $0x48] sm:$0xff]  ;;  %v70_v20 = vld [vmem:[#allocation6 + $0x30] sm:$0xff]  ;;  %p465_p1 = scmp.ne.s32.totalorder %s316_s2, %s464_s28  ;;  %p470_p3 = scmp.lt.s32.totalorder %s464_s28, %s464_s28 }
  0x2a   :  { %v138_v8 = vpack.c.b16 %v107_v4, %v107_v4  ;;  %v136_v9 = vpack.c.b16 %v106_v5, %v106_v5  ;;  %v134_v10 = vpack.c.b16 %v105_v6, %v105_v6  ;;  %v132_v11 = vpack.c.b16 %v104_v7, %v104_v7 }
  0x2b   :  { %v130_v24 = vpack.c.b16 %v103_v18, %v103_v18  ;;  %v128_v30 = vpack.c.b16 %v102_v19, %v102_v19  ;;  %v126_v36 = vpack.c.b16 %v101_v28, %v101_v28  ;;  %v89_v38 = vsel %vm85_vm8, 16843009, %v495_v1  ;;  %p471_p4 = por %p470_p3, %p469_p2 }
  0x2c   :  { %v139_v13 = vpack.c.b8 %v138_v8, %v138_v8  ;;  %v137_v14 = vpack.c.b8 %v136_v9, %v136_v9  ;;  %v135_v15 = vpack.c.b8 %v134_v10, %v134_v10  ;;  %v133_v16 = vpack.c.b8 %v132_v11, %v132_v11  ;;  %v72_v8 = vld [vmem:[#allocation6 + $0x40] sm:$0xff] }
  0x2d   :  { %v131_v29 = vpack.c.b8 %v130_v24, %v130_v24  ;;  %v129_v35 = vpack.c.b8 %v128_v30, %v128_v30  ;;  %v127_v42 = vpack.c.b8 %v126_v36, %v126_v36  ;;  %v124_v43 = vpack.c.b16 %v100_v37, %v100_v37  ;;  %p472_p5 = pnand %p471_p4, %p465_p1 }
  0x2e   :  { %vm155_vm2 = vnez %v139_v13  ;;  %vm154_vm3 = vnez %v137_v14  ;;  %vm153_vm4 = vnez %v135_v15  ;;  %vm152_vm5 = vnez %v133_v16  ;;  %v71_v14 = vld [vmem:[#allocation6 + $0x38] sm:$0xff] }
  0x2f   :  { %v171_v21 = vsel %vm155_vm2, 16843009, %v495_v1  ;;  %v170_v22 = vsel %vm154_vm3, 16843009, %v495_v1  ;;  %v169_v23 = vsel %vm153_vm4, 16843009, %v495_v1  ;;  %vm151_vm9 = vnez %v131_v29 }
  0x30   :  { %v187_v26 = vunpack.c.0.s8 %v171_v21  ;;  %v186_v27 = vunpack.c.0.s8 %v170_v22  ;;  %v185_v33 = vunpack.c.0.s8 %v169_v23  ;;  %v168_v34 = vsel %vm152_vm5, 16843009, %v495_v1 }
  0x31   :  { %v184_v40 = vunpack.c.0.s8 %v168_v34  ;;  %v167_v41 = vsel %vm151_vm9, 16843009, %v495_v1  ;;  %vm150_vm11 = vnez %v129_v35  ;;  %v99_v44 = vunpack.c.3.s8 %v89_v38  ;;  %v67_v35 = vld [vmem:[#allocation6 + $0x18] sm:$0xff] }
  0x32   :  { %vm203_vm6 = vcmp.ne.s32.totalorder %v187_v26, 0  ;;  %vm540_vm7 = vcmp.ne.s32.totalorder %v186_v27, 0  ;;  %vm201_vm10 = vcmp.ne.s32.totalorder %v185_v33, 0  ;;  %v183_v46 = vunpack.c.0.s8 %v167_v41  ;;  %v69_v26 = vld [vmem:[#allocation6 + $0x28] sm:$0xff] }
  0x33   :  { %362 = vmatprep.subr.msk.mxu0 %vm203_vm6, %v79_v25  ;;  %vm200_vm12 = vcmp.ne.s32.totalorder %v184_v40, 0  ;;  %v166_v47 = vsel %vm150_vm11, 16843009, %v495_v1  ;;  %vm149_vm13 = vnez %v127_v42  ;;  %v125_v48 = vpack.c.b8 %v124_v43, %v124_v43  ;;  %v65_v41 = vld [vmem:[#allocation6 + $0x8] sm:$0xff]  ;;  %v64_v43 = vld [vmem:[#allocation6] sm:$0xff] }
  0x34   :  { %363 = vmatpush3.xpose.msk.msra.mxu0 %vm203_vm6, %v79_v25  ;;  %v122_v49 = vpack.c.b16 %v99_v44, %v99_v44  ;;  %v98_v50 = vunpack.c.2.s8 %v89_v38  ;;  %vm199_vm14 = vcmp.ne.s32.totalorder %v183_v46, 0  ;;  %v182_v52 = vunpack.c.0.s8 %v166_v47  ;;  %v223_v44 = vld [vmem:[#allocation3 + $0x8] sm:$0xff] }
  0x35   :  { %364 = vmatprep.subr.msk.mxu0 %vm540_vm7, %v78_v31  ;;  %v165_v53 = vsel %vm149_vm13, 16843009, %v495_v1  ;;  %vm148_vm15 = vnez %v125_v48  ;;  %v97_v57 = vunpack.c.1.s8 %v89_v38  ;;  %vm84_vm1 = vnez %v80_v54 }
  0x36   :  { %v123_v55 = vpack.c.b8 %v122_v49, %v122_v49  ;;  %v120_v56 = vpack.c.b16 %v98_v50, %v98_v50  ;;  %vm198_vm0 = vcmp.ne.s32.totalorder %v182_v52, 0  ;;  %v181_v59 = vunpack.c.0.s8 %v165_v53 }
  0x37   :  { %v164_v60 = vsel %vm148_vm15, 16843009, %v495_v1  ;;  %v118_v62 = vpack.c.b16 %v97_v57, %v97_v57  ;;  %v96_v63 = vunpack.c.0.s8 %v89_v38  ;;  %v88_v0 = vsel %vm84_vm1, 16843009, %v495_v1  ;;  %v66_v38 = vld [vmem:[#allocation6 + $0x10] sm:$0xff] }
  0x38   :  { %365 = vmatpush3.xpose.msk.msra.mxu0 %vm540_vm7, %v78_v31  ;;  %vm147_vm2 = vnez %v123_v55  ;;  %v121_v61 = vpack.c.b8 %v120_v56, %v120_v56  ;;  %vm197_vm3 = vcmp.ne.s32.totalorder %v181_v59, 0  ;;  %v180_v3 = vunpack.c.0.s8 %v164_v60  ;;  %v68_v31 = vld [vmem:[#allocation6 + $0x20] sm:$0xff] }
  0x39   :  { %366 = vmatprep.subr.msk.mxu0 %vm201_vm10, %v77_v39  ;;  %v163_v4 = vsel %vm147_vm2, 16843009, %v495_v1  ;;  %v119_v5 = vpack.c.b8 %v118_v62, %v118_v62  ;;  %v116_v6 = vpack.c.b16 %v96_v63, %v96_v63  ;;  %v95_v7 = vunpack.c.3.s8 %v88_v0 }
  0x3a   :  { %vm146_vm4 = vnez %v121_v61  ;;  %vm196_vm5 = vcmp.ne.s32.totalorder %v180_v3, 0  ;;  %v179_v9 = vunpack.c.0.s8 %v163_v4  ;;  %v94_v13 = vunpack.c.2.s8 %v88_v0 }
  0x3b   :  { %v162_v10 = vsel %vm146_vm4, 16843009, %v495_v1  ;;  %vm145_vm6 = vnez %v119_v5  ;;  %v117_v11 = vpack.c.b8 %v116_v6, %v116_v6  ;;  %v114_v12 = vpack.c.b16 %v95_v7, %v95_v7 }
  0x3c   :  { %367 = vmatpush3.xpose.msk.msra.mxu0 %vm201_vm10, %v77_v39  ;;  %vm195_vm7 = vcmp.ne.s32.totalorder %v179_v9, 0  ;;  %v178_v15 = vunpack.c.0.s8 %v162_v10  ;;  %v161_v16 = vsel %vm145_vm6, 16843009, %v495_v1  ;;  %v112_v18 = vpack.c.b16 %v94_v13, %v94_v13 }
  0x3d   :  { %368 = vmatprep.subr.msk.mxu0 %vm200_vm12, %v76_v45  ;;  %vm144_vm8 = vnez %v117_v11  ;;  %v115_v17 = vpack.c.b8 %v114_v12, %v114_v12  ;;  %v93_v19 = vunpack.c.1.s8 %v88_v0  ;;  %v177_v21 = vunpack.c.0.s8 %v161_v16 }
  0x3e   :  { %vm194_vm9 = vcmp.ne.s32.totalorder %v178_v15, 0  ;;  %v160_v22 = vsel %vm144_vm8, 16843009, %v495_v1  ;;  %v113_v23 = vpack.c.b8 %v112_v18, %v112_v18  ;;  %v92_v25 = vunpack.c.0.s8 %v88_v0 }
  0x3f   :  { %vm143_vm10 = vnez %v115_v17  ;;  %v110_v24 = vpack.c.b16 %v93_v19, %v93_v19  ;;  %vm193_vm11 = vcmp.ne.s32.totalorder %v177_v21, 0  ;;  %v176_v27 = vunpack.c.0.s8 %v160_v22 }
  0x40   :  { %369 = vmatpush3.xpose.msk.msra.mxu0 %vm200_vm12, %v76_v45  ;;  %v159_v28 = vsel %vm143_vm10, 16843009, %v495_v1  ;;  %vm142_vm12 = vnez %v113_v23  ;;  %v108_v30 = vpack.c.b16 %v92_v25, %v92_v25 }
  0x41   :  { %370 = vmatprep.subr.msk.mxu0 %vm199_vm14, %v75_v51  ;;  %v111_v29 = vpack.c.b8 %v110_v24, %v110_v24  ;;  %vm192_vm13 = vcmp.ne.s32.totalorder %v176_v27, 0  ;;  %v175_v32 = vunpack.c.0.s8 %v159_v28  ;;  %v158_v33 = vsel %vm142_vm12, 16843009, %v495_v1 }
  0x42   :  { %v109_v34 = vpack.c.b8 %v108_v30, %v108_v30  ;;  %v174_v36 = vunpack.c.0.s8 %v158_v33 }
  0x43   :  { %vm191_vm15 = vcmp.ne.s32.totalorder %v175_v32, 0 }
  0x44   :  { %371 = vmatpush3.xpose.msk.msra.mxu0 %vm199_vm14, %v75_v51  ;;  %vm141_vm14 = vnez %v111_v29  ;;  %vm190_vm1 = vcmp.ne.s32.totalorder %v174_v36, 0 }
  0x45   :  { %372 = vmatprep.subr.msk.mxu0 %vm198_vm0, %v74_v58  ;;  %v157_v37 = vsel %vm141_vm14, 16843009, %v495_v1 }
  0x46   :  { %v173_v39 = vunpack.c.0.s8 %v157_v37 }
  0x48   :  { %373 = vmatpush3.xpose.msk.msra.mxu0 %vm198_vm0, %v74_v58  ;;  %vm140_vm0 = vnez %v109_v34  ;;  %vm189_vm2 = vcmp.ne.s32.totalorder %v173_v39, 0 }
  0x49   :  { %374 = vmatprep.subr.msk.mxu0 %vm197_vm3, %v73_v2  ;;  %v156_v40 = vsel %vm140_vm0, 16843009, %v495_v1 }
  0x4a   :  { %v172_v42 = vunpack.c.0.s8 %v156_v40 }
  0x4c   :  { %375 = vmatpush3.xpose.msk.msra.mxu0 %vm197_vm3, %v73_v2  ;;  %vm188_vm3 = vcmp.ne.s32.totalorder %v172_v42, 0 }
  0x4d   :  { %376 = vmatprep.subr.msk.mxu0 %vm196_vm5, %v72_v8 }
  0x50   :  { %377 = vmatpush3.xpose.msk.msra.mxu0 %vm196_vm5, %v72_v8 }
  0x51   :  { %378 = vmatprep.subr.msk.mxu0 %vm195_vm7, %v71_v14 }
  0x54   :  { %379 = vmatpush3.xpose.msk.msra.mxu0 %vm195_vm7, %v71_v14 }
  0x55   :  { %380 = vmatprep.subr.msk.mxu0 %vm194_vm9, %v70_v20 }
  0x58   :  { %381 = vmatpush3.xpose.msk.msra.mxu0 %vm194_vm9, %v70_v20 }
  0x59   :  { %382 = vmatprep.subr.msk.mxu0 %vm193_vm11, %v69_v26 }
  0x5c   :  { %383 = vmatpush3.xpose.msk.msra.mxu0 %vm193_vm11, %v69_v26 }
  0x5d   :  { %384 = vmatprep.subr.msk.mxu0 %vm192_vm13, %v68_v31 }
  0x60   :  { %385 = vmatpush3.xpose.msk.msra.mxu0 %vm192_vm13, %v68_v31 }
  0x61   :  { %386 = vmatprep.subr.msk.mxu0 %vm191_vm15, %v67_v35 }
  0x64   :  { %387 = vmatpush3.xpose.msk.msra.mxu0 %vm191_vm15, %v67_v35 }
  0x65   :  { %388 = vmatprep.subr.msk.mxu0 %vm190_vm1, %v66_v38 }
  0x68   :  { %389 = vmatpush3.xpose.msk.msra.mxu0 %vm190_vm1, %v66_v38 }
  0x69   :  { %390 = vmatprep.subr.msk.mxu0 %vm189_vm2, %v65_v41 }
  0x6c   :  { %391 = vmatpush3.xpose.msk.msra.mxu0 %vm189_vm2, %v65_v41 }
  0x6d   :  { %392 = vmatprep.subr.msk.mxu0 %vm188_vm3, %v64_v43 }
  0x70   :  { %393 = vmatpush3.xpose.msk.msra.mxu0 %vm188_vm3, %v64_v43 }
  0x73   :  { %395 = vmatmul.mubr.f32.vlgmr.msra.gmra.mxu0 %v223_v44 }
 0x133   :  { %v396_v45 = vpop.f32.mrf.mxu0 }
 0x134   :  { %309 = vst [vmem:[#allocation9 + $0x8] sm:$0xff] %v396_v45 }
 0x135   :  { %v290_v1 = vpop.f32.mrf.mxu0 }
 0x136   :  { %308 = vst [vmem:[#allocation9] sm:$0xff] %v290_v1 }
 0x137   :  { %475 = shalt.err (!%p472_p5)
}
 0x138   :  { %321 = dma.vmem_to_hbm [thread:$0]  %s316_s2, 256, %s572_s3, [#allocation5], %s492_s17, %s492_s17, %s493_s18  }
 0x139   :  { %488 = dma.done.wait [#allocation5], 256  }
 0x13a   :  { %489 = vsyncadd [#allocation5], 4294967040 }
 0x13b   :  { %325 = vsyncpa [#allocation4], 1 }
 0x13c   :  { %326 = vsyncpa [#allocation7], 1 }
 0x13d   :  { %327 = vsyncpa [#allocation5], 1 }

</bundles_post_ra>
